<compile_context>
chip_gen: v6e
topology: v6e:2x2x1
jax: 0.10.0
libtpu: 0.0.40
codegen_flags: <defaults>
</compile_context>

<pallas_src>
import functools

import jax
import jax.numpy as jnp
from jax import lax
from jax.experimental import pallas as pl
from jax.experimental.pallas import tpu as pltpu


def _restriction_kernel(x_ref, w_ref, out_ref, *, nb, p, cg,
                        eps=1e-5, slope=0.2):
    """One lane-tile of nb samples: conv(+bias) -> GroupNorm(2) -> LeakyReLU.

    x_ref : (K_aug, L) im2col patches; row K is all-ones (bias), rows K+1..K+2
            are zeros (they pair with the gamma/beta columns of the weight).
    w_ref : (C_out, K_aug) packed [conv weight | bias | gamma | beta].
    out_ref: (C_out, L) lane-dense output, L = nb * p.
    """
    x = x_ref[...]                         # (K_aug, L)
    w = w_ref[...]                         # (C, K_aug)
    c = w.shape[0]
    k = w.shape[1] - 3                     # true contraction depth (K = 9*C_in)

    gamma = w[:, k + 1:k + 2]              # (C, 1)
    beta = w[:, k + 2:k + 3]               # (C, 1)

    # Conv + bias in a single MXU matmul (bias folded in via the ones row of x;
    # the gamma/beta columns multiply zero patch rows, so they don't pollute y).
    y = jnp.dot(w, x, preferred_element_type=jnp.float32)      # (C, L) lane-dense

    # ---- GroupNorm(2): single-pass per-(channel, sample) sums (f32 accum) ----
    s1_cols, s2_cols = [], []
    for n in range(nb):                                         # nb is static
        ys = y[:, n * p:(n + 1) * p]                            # (C, P) static slice
        s1_cols.append(jnp.sum(ys, axis=1, keepdims=True))      # (C, 1)
        s2_cols.append(jnp.sum(ys * ys, axis=1, keepdims=True)) # (C, 1)
    s1 = jnp.concatenate(s1_cols, axis=1)                       # (C, NB)
    s2 = jnp.concatenate(s2_cols, axis=1)                       # (C, NB)

    # Group reduce across channels (num_groups hard-wired to 2, as in the module).
    npg = float(cg * p)
    ridx = lax.broadcasted_iota(jnp.int32, (c, 1), 0)
    in_g0 = ridx < cg                                           # (C, 1)
    mean = jnp.where(in_g0,
                     jnp.sum(s1[:cg], axis=0, keepdims=True),
                     jnp.sum(s1[cg:], axis=0, keepdims=True)) / npg   # (C, NB)
    ex2 = jnp.where(in_g0,
                    jnp.sum(s2[:cg], axis=0, keepdims=True),
                    jnp.sum(s2[cg:], axis=0, keepdims=True)) / npg    # (C, NB)
    var = ex2 - mean * mean
    a = gamma * lax.rsqrt(var + eps)                            # (C, NB)
    b = beta - mean * a                                         # (C, NB)

    # Broadcast per-sample affine across that sample's lanes; fused
    # normalize + affine + LeakyReLU (one full-tile pass, unmasked store).
    a_full = jnp.concatenate(
        [jnp.broadcast_to(a[:, n:n + 1], (c, p)) for n in range(nb)], axis=1)
    b_full = jnp.concatenate(
        [jnp.broadcast_to(b[:, n:n + 1], (c, p)) for n in range(nb)], axis=1)
    z = y * a_full + b_full
    out_ref[...] = jnp.where(z > 0, z, slope * z)


def restriction_operator(x_nchw, w_hwio, b, gamma, beta, *, stride):
    """x_nchw: (N, C_in, H, W) f32.  w_hwio: (3, 3, C_in, C_out).  Returns NCHW."""
    N, C_in, H, W = x_nchw.shape
    KH, KW, _, C_out = w_hwio.shape
    pad = 1
    H_out = (H + 2 * pad - KH) // stride + 1
    W_out = (W + 2 * pad - KW) // stride + 1
    P = H_out * W_out
    K = KH * KW * C_in
    K_aug = K + 3                                   # + ones row + 2 zero rows

    # Samples fused per grid step so the lane dim is a multiple of 128 when
    # possible (N=2, P=64 -> one 128-lane step).
    if P >= 128:
        nb = 1
    else:
        nb = min(N, max(1, 128 // P))
        while N % nb != 0:
            nb -= 1
    num_tiles = N // nb
    L = nb * P
    NP = N * P

    # ---- glue: pad NCHW once, build lane-fused im2col (K, N*P), n-major ----
    x_pad = jnp.pad(x_nchw, ((0, 0), (0, 0), (pad, pad), (pad, pad)))
    x_cn = jnp.transpose(x_pad, (1, 0, 2, 3))       # (C_in, N, H+2, W+2)
    taps = []
    for kh in range(KH):
        for kw in range(KW):
            t = x_cn[:, :,
                     kh:kh + stride * (H_out - 1) + 1:stride,
                     kw:kw + stride * (W_out - 1) + 1:stride]   # (C_in, N, Ho, Wo)
            taps.append(t.reshape(C_in, NP))
    patches = jnp.concatenate(taps, axis=0)                      # (K, N*P)
    patches_aug = jnp.concatenate(
        [patches,
         jnp.ones((1, NP), jnp.float32),                         # bias row
         jnp.zeros((2, NP), jnp.float32)], axis=0)               # gamma/beta rows

    # Packed weight: [conv weight | bias | gamma | beta]  -> one operand stream.
    w_ck = jnp.transpose(w_hwio.reshape(K, C_out), (1, 0))       # (C_out, K)
    w_pack = jnp.concatenate(
        [w_ck, b[:, None], gamma[:, None], beta[:, None]], axis=1)  # (C_out, K+3)

    cost = pl.CostEstimate(
        flops=2 * C_out * K_aug * NP + 10 * C_out * NP,
        transcendentals=C_out * N,
        bytes_accessed=4 * (K_aug * NP + C_out * K_aug + C_out * NP))

    out = pl.pallas_call(
        functools.partial(_restriction_kernel, nb=nb, p=P, cg=C_out // 2),
        out_shape=jax.ShapeDtypeStruct((C_out, NP), jnp.float32),
        grid_spec=pltpu.PrefetchScalarGridSpec(
            num_scalar_prefetch=0,
            grid=(num_tiles,),
            in_specs=[
                pl.BlockSpec((K_aug, L), lambda t: (0, t)),
                pl.BlockSpec((C_out, K_aug), lambda t: (0, 0)),
            ],
            out_specs=pl.BlockSpec((C_out, L), lambda t: (0, t)),
        ),
        compiler_params=pltpu.CompilerParams(
            dimension_semantics=("parallel",),
            vmem_limit_bytes=32 * 1024 * 1024),
        cost_estimate=cost,
    )(patches_aug, w_pack)

    # (C_out, N*P) -> (N, C_out, H_out, W_out); tiny wrapper transpose.
    return jnp.transpose(out.reshape(C_out, N, H_out, W_out), (1, 0, 2, 3))


def _reference(x_nchw, w_hwio, b, gamma, beta, *, stride):
    """Pure-JAX reference (conv + GroupNorm(2) + LeakyReLU(0.2)), NCHW output."""
    x_nhwc = jnp.transpose(x_nchw, (0, 2, 3, 1))
    y = lax.conv_general_dilated(
        x_nhwc, w_hwio, window_strides=(stride, stride),
        padding=((1, 1), (1, 1)),
        dimension_numbers=("NHWC", "HWIO", "NHWC")) + b
    N, Ho, Wo, C = y.shape
    g = 2
    yg = y.reshape(N, Ho, Wo, g, C // g)
    mean = jnp.mean(yg, axis=(1, 2, 4), keepdims=True)
    var = jnp.mean((yg - mean) ** 2, axis=(1, 2, 4), keepdims=True)
    yn = ((yg - mean) * lax.rsqrt(var + 1e-5)).reshape(N, Ho, Wo, C)
    ya = yn * gamma + beta
    out = jnp.where(ya > 0, ya, 0.2 * ya)
    return jnp.transpose(out, (0, 3, 1, 2))


if __name__ == "__main__":
    key = jax.random.PRNGKey(0)
    k_x, k_w, k_b, k_g, k_be = jax.random.split(key, 5)

    N, C_in, H, W = 2, 4, 16, 16
    C_out, stride = 8, 2

    x = jax.random.normal(k_x, (N, C_in, H, W), dtype=jnp.float32)
    fan_in = C_in * 3 * 3
    bound = 1.0 / (fan_in ** 0.5)
    w = jax.random.uniform(k_w, (3, 3, C_in, C_out), jnp.float32, -bound, bound)
    b = jax.random.uniform(k_b, (C_out,), jnp.float32, -bound, bound)
    gamma = 1.0 + 0.1 * jax.random.normal(k_g, (C_out,), jnp.float32)
    beta = 0.1 * jax.random.normal(k_be, (C_out,), jnp.float32)

    fn = jax.jit(functools.partial(restriction_operator, stride=stride))
    out = jax.block_until_ready(fn(x, w, b, gamma, beta))

    ref = _reference(x, w, b, gamma, beta, stride=stride)
    assert out.shape == (N, C_out, H // stride, W // stride), out.shape
    assert jnp.allclose(out, ref, atol=1e-4, rtol=1e-4), float(
        jnp.max(jnp.abs(out - ref)))

    print("KERNEL_OK")
</pallas_src>

<mosaic_0001>
module attributes {stable_mosaic.version = 11 : i64} {
  func.func @_restriction_kernel(%arg0: i32, %arg1: memref<39x128xf32, #tpu.memory_space<vmem>>, %arg2: memref<8x39xf32, #tpu.memory_space<vmem>>, %arg3: memref<8x128xf32, #tpu.memory_space<vmem>>) attributes {dimension_semantics = [#tpu.dimension_semantics<parallel>], iteration_bounds = array<i64: 1>, scalar_prefetch = 0 : i64, scratch_operands = 0 : i64, tpu.core_type = #tpu.core_type<tc>, window_params = [{transform_indices = @transform_0, window_bounds = array<i64: 39, 128>}, {pipeline_mode = #tpu.pipeline_mode<synchronous>, transform_indices = @transform_1, window_bounds = array<i64: 8, 39>}, {transform_indices = @transform_2, window_bounds = array<i64: 8, 128>}]} {
    %c0 = arith.constant 0 : index
    %c0_0 = arith.constant 0 : index
    %0 = vector.load %arg1[%c0, %c0_0] : memref<39x128xf32, #tpu.memory_space<vmem>>, vector<39x128xf32>
    %c0_1 = arith.constant 0 : index
    %c0_2 = arith.constant 0 : index
    %1 = vector.load %arg2[%c0_1, %c0_2] : memref<8x39xf32, #tpu.memory_space<vmem>>, vector<8x39xf32>
    %2 = vector.extract_strided_slice %1 {offsets = [0, 37], sizes = [8, 1], strides = [1, 1]} : vector<8x39xf32> to vector<8x1xf32>
    %3 = vector.extract_strided_slice %1 {offsets = [0, 38], sizes = [8, 1], strides = [1, 1]} : vector<8x39xf32> to vector<8x1xf32>
    %cst = arith.constant dense<0.000000e+00> : vector<8x128xf32>
    %4 = tpu.matmul %1, %0, %cst {dimension_numbers = #tpu.dot_dimension_numbers<[1], [0], [0], [1], [0, 0, 1, 1], [], []>} : vector<8x39xf32>, vector<39x128xf32>, vector<8x128xf32> -> vector<8x128xf32>
    %5 = vector.extract_strided_slice %4 {offsets = [0, 0], sizes = [8, 64], strides = [1, 1]} : vector<8x128xf32> to vector<8x64xf32>
    %cst_3 = arith.constant dense<0.000000e+00> : vector<8xf32>
    %6 = vector.multi_reduction <add>, %5, %cst_3 [1] : vector<8x64xf32> to vector<8xf32>
    %7 = vector.shape_cast %6 : vector<8xf32> to vector<8x1xf32>
    %8 = arith.mulf %5, %5 : vector<8x64xf32>
    %cst_4 = arith.constant dense<0.000000e+00> : vector<8xf32>
    %9 = vector.multi_reduction <add>, %8, %cst_4 [1] : vector<8x64xf32> to vector<8xf32>
    %10 = vector.shape_cast %9 : vector<8xf32> to vector<8x1xf32>
    %11 = vector.extract_strided_slice %4 {offsets = [0, 64], sizes = [8, 64], strides = [1, 1]} : vector<8x128xf32> to vector<8x64xf32>
    %cst_5 = arith.constant dense<0.000000e+00> : vector<8xf32>
    %12 = vector.multi_reduction <add>, %11, %cst_5 [1] : vector<8x64xf32> to vector<8xf32>
    %13 = vector.shape_cast %12 : vector<8xf32> to vector<8x1xf32>
    %14 = arith.mulf %11, %11 : vector<8x64xf32>
    %cst_6 = arith.constant dense<0.000000e+00> : vector<8xf32>
    %15 = vector.multi_reduction <add>, %14, %cst_6 [1] : vector<8x64xf32> to vector<8xf32>
    %16 = vector.shape_cast %15 : vector<8xf32> to vector<8x1xf32>
    %17 = tpu.concatenate %7, %13 in 1 : vector<8x1xf32>, vector<8x1xf32> -> vector<8x2xf32>
    %18 = tpu.concatenate %10, %16 in 1 : vector<8x1xf32>, vector<8x1xf32> -> vector<8x2xf32>
    %19 = tpu.iota {dimensions = array<i32: 0>} : vector<8x1xi32>
    %c4_i32 = arith.constant 4 : i32
    %20 = vector.broadcast %c4_i32 : i32 to vector<8x1xi32>
    %21 = arith.cmpi slt, %19, %20 : vector<8x1xi32>
    %22 = vector.extract_strided_slice %17 {offsets = [0, 0], sizes = [4, 2], strides = [1, 1]} : vector<8x2xf32> to vector<4x2xf32>
    %cst_7 = arith.constant dense<0.000000e+00> : vector<2xf32>
    %23 = vector.multi_reduction <add>, %22, %cst_7 [0] : vector<4x2xf32> to vector<2xf32>
    %24 = vector.shape_cast %23 : vector<2xf32> to vector<1x2xf32>
    %25 = vector.extract_strided_slice %17 {offsets = [4, 0], sizes = [4, 2], strides = [1, 1]} : vector<8x2xf32> to vector<4x2xf32>
    %cst_8 = arith.constant dense<0.000000e+00> : vector<2xf32>
    %26 = vector.multi_reduction <add>, %25, %cst_8 [0] : vector<4x2xf32> to vector<2xf32>
    %27 = vector.shape_cast %26 : vector<2xf32> to vector<1x2xf32>
    %28 = vector.shape_cast %21 : vector<8x1xi1> to vector<8x1xi1>
    %29 = vector.broadcast %28 : vector<8x1xi1> to vector<8x2xi1>
    %30 = vector.shape_cast %24 : vector<1x2xf32> to vector<1x2xf32>
    %31 = vector.broadcast %30 : vector<1x2xf32> to vector<8x2xf32>
    %32 = vector.shape_cast %27 : vector<1x2xf32> to vector<1x2xf32>
    %33 = vector.broadcast %32 : vector<1x2xf32> to vector<8x2xf32>
    %34 = arith.select %29, %31, %33 : vector<8x2xi1>, vector<8x2xf32>
    %cst_9 = arith.constant 2.560000e+02 : f32
    %35 = vector.broadcast %cst_9 : f32 to vector<8x2xf32>
    %36 = arith.divf %34, %35 : vector<8x2xf32>
    %37 = vector.extract_strided_slice %18 {offsets = [0, 0], sizes = [4, 2], strides = [1, 1]} : vector<8x2xf32> to vector<4x2xf32>
    %cst_10 = arith.constant dense<0.000000e+00> : vector<2xf32>
    %38 = vector.multi_reduction <add>, %37, %cst_10 [0] : vector<4x2xf32> to vector<2xf32>
    %39 = vector.shape_cast %38 : vector<2xf32> to vector<1x2xf32>
    %40 = vector.extract_strided_slice %18 {offsets = [4, 0], sizes = [4, 2], strides = [1, 1]} : vector<8x2xf32> to vector<4x2xf32>
    %cst_11 = arith.constant dense<0.000000e+00> : vector<2xf32>
    %41 = vector.multi_reduction <add>, %40, %cst_11 [0] : vector<4x2xf32> to vector<2xf32>
    %42 = vector.shape_cast %41 : vector<2xf32> to vector<1x2xf32>
    %43 = vector.shape_cast %21 : vector<8x1xi1> to vector<8x1xi1>
    %44 = vector.broadcast %43 : vector<8x1xi1> to vector<8x2xi1>
    %45 = vector.shape_cast %39 : vector<1x2xf32> to vector<1x2xf32>
    %46 = vector.broadcast %45 : vector<1x2xf32> to vector<8x2xf32>
    %47 = vector.shape_cast %42 : vector<1x2xf32> to vector<1x2xf32>
    %48 = vector.broadcast %47 : vector<1x2xf32> to vector<8x2xf32>
    %49 = arith.select %44, %46, %48 : vector<8x2xi1>, vector<8x2xf32>
    %cst_12 = arith.constant 2.560000e+02 : f32
    %50 = vector.broadcast %cst_12 : f32 to vector<8x2xf32>
    %51 = arith.divf %49, %50 : vector<8x2xf32>
    %52 = arith.mulf %36, %36 : vector<8x2xf32>
    %53 = arith.subf %51, %52 : vector<8x2xf32>
    %cst_13 = arith.constant 9.99999974E-6 : f32
    %54 = vector.broadcast %cst_13 : f32 to vector<8x2xf32>
    %55 = arith.addf %53, %54 : vector<8x2xf32>
    %56 = math.rsqrt %55 : vector<8x2xf32>
    %57 = vector.broadcast %2 : vector<8x1xf32> to vector<8x2xf32>
    %58 = arith.mulf %57, %56 : vector<8x2xf32>
    %59 = arith.mulf %36, %58 : vector<8x2xf32>
    %60 = vector.broadcast %3 : vector<8x1xf32> to vector<8x2xf32>
    %61 = arith.subf %60, %59 : vector<8x2xf32>
    %62 = vector.extract_strided_slice %58 {offsets = [0, 0], sizes = [8, 1], strides = [1, 1]} : vector<8x2xf32> to vector<8x1xf32>
    %63 = vector.shape_cast %62 : vector<8x1xf32> to vector<8x1xf32>
    %64 = vector.broadcast %63 : vector<8x1xf32> to vector<8x64xf32>
    %65 = vector.extract_strided_slice %58 {offsets = [0, 1], sizes = [8, 1], strides = [1, 1]} : vector<8x2xf32> to vector<8x1xf32>
    %66 = vector.shape_cast %65 : vector<8x1xf32> to vector<8x1xf32>
    %67 = vector.broadcast %66 : vector<8x1xf32> to vector<8x64xf32>
    %68 = tpu.concatenate %64, %67 in 1 : vector<8x64xf32>, vector<8x64xf32> -> vector<8x128xf32>
    %69 = vector.extract_strided_slice %61 {offsets = [0, 0], sizes = [8, 1], strides = [1, 1]} : vector<8x2xf32> to vector<8x1xf32>
    %70 = vector.shape_cast %69 : vector<8x1xf32> to vector<8x1xf32>
    %71 = vector.broadcast %70 : vector<8x1xf32> to vector<8x64xf32>
    %72 = vector.extract_strided_slice %61 {offsets = [0, 1], sizes = [8, 1], strides = [1, 1]} : vector<8x2xf32> to vector<8x1xf32>
    %73 = vector.shape_cast %72 : vector<8x1xf32> to vector<8x1xf32>
    %74 = vector.broadcast %73 : vector<8x1xf32> to vector<8x64xf32>
    %75 = tpu.concatenate %71, %74 in 1 : vector<8x64xf32>, vector<8x64xf32> -> vector<8x128xf32>
    %76 = arith.mulf %4, %68 : vector<8x128xf32>
    %77 = arith.addf %76, %75 : vector<8x128xf32>
    %cst_14 = arith.constant 0.000000e+00 : f32
    %78 = vector.broadcast %cst_14 : f32 to vector<8x128xf32>
    %79 = arith.cmpf ogt, %77, %78 : vector<8x128xf32>
    %cst_15 = arith.constant 2.000000e-01 : f32
    %80 = vector.broadcast %cst_15 : f32 to vector<8x128xf32>
    %81 = arith.mulf %80, %77 : vector<8x128xf32>
    %82 = arith.select %79, %77, %81 : vector<8x128xi1>, vector<8x128xf32>
    %c0_16 = arith.constant 0 : index
    %c0_17 = arith.constant 0 : index
    %83 = vector.load %arg3[%c0_16, %c0_17] : memref<8x128xf32, #tpu.memory_space<vmem>>, vector<8x128xf32>
    tpu.vector_store %arg3[%c0_16, %c0_17], %82 {strides = array<i32>} : memref<8x128xf32, #tpu.memory_space<vmem>>, vector<8x128xf32>,
    return
  }
  func.func @transform_0(%arg0: i32) -> (i32, i32) {
    %c0_i32 = arith.constant 0 : i32
    %c0_i32_0 = arith.constant 0 : i32
    return %c0_i32, %arg0 : i32, i32
  }
  func.func @transform_1(%arg0: i32) -> (i32, i32) {
    %c0_i32 = arith.constant 0 : i32
    %c0_i32_0 = arith.constant 0 : i32
    %c0_i32_1 = arith.constant 0 : i32
    return %c0_i32, %c0_i32_0 : i32, i32
  }
  func.func @transform_2(%arg0: i32) -> (i32, i32) {
    %c0_i32 = arith.constant 0 : i32
    %c0_i32_0 = arith.constant 0 : i32
    return %c0_i32, %arg0 : i32, i32
  }
}

</mosaic_0001>

<bundles_post_ra>
// kernel: restriction_operator.1
= control target key start
LH: loop header
LB: loop body
LE: loop exit
PB: predicated region body
PF: predicated region fallthrough
CT: control target
= control target key end

     0   :  { %vm21_vm0 = vcmask 1046528   ;;  %v246_v0 = vmov 0.0   ;;  %vm247_vm1 = vmmov 0   ;;  %vm17_vm2 = vcmask 318464   ;;  %s248_s21 = smov 64   ;;  %s306_s0 = inlined_call_operand.vmem [shape: f32[39,128], index: 0, kind: input, shape index: {}]   ;;  %s307_s1 = inlined_call_operand.vmem [shape: f32[8,39], index: 1, kind: input, shape index: {}]   ;;  %s308_s2 = inlined_call_operand.vmem [shape: f32[8,128], index: 2, kind: output, shape index: {}]  }
   0x1   :  { %218 = vmatprep.subr.mxu0 %v246_v0  ;;  %v15_v1 = vld [vmem:[%s306_s0 + $0x20] sm:$0x7f]  ;;  %v14_v2 = vld [vmem:[%s306_s0 + $0x18] sm:$0xff]  ;;  %228 = vmatprep.mubr.msk.f32.mxu0 %vm247_vm1, %v246_v0  ;;  %v13_v3 = vld [vmem:[%s306_s0 + $0x10] sm:$0xff]  ;;  %vm95_vm3 = vcmask 523264   ;;  %v249_v11 = vmov 37   ;;  %v120_v31 = vlaneseq }
   0x2   :  { %219 = vmatpush3.msk.msra.mxu0 %vm21_vm0, %v15_v1  ;;  %v12_v4 = vld [vmem:[%s306_s0 + $0x8] sm:$0xff]  ;;  %v11_v5 = vld [vmem:[%s306_s0] sm:$0xff]  ;;  %238 = vset.pattern.permute.xlu1 %v249_v11  ;;  %v250_v17 = vmov 38   ;;  %v251_v18 = vmov 0   ;;  %vm117_vm4 = vcmask 7168   ;;  %vm123_vm5 = vcmask 11264  }
   0x3   :  { %220 = vmatprep.subr.mxu0 %v246_v0  ;;  %v16_v6 = vld [vmem:[%s307_s1] sm:$0xff]  ;;  %242 = vset.pattern.permute.xlu0 %v251_v18  ;;  %v121_v42 = vshrl.u32 %v120_v31, 7 }
   0x4   :  { %221 = vmatpush3.msra.mxu0 %v14_v2 }
   0x5   :  { %222 = vmatprep.subr.mxu0 %v246_v0  ;;  %vm122_vm6 = vcmp.lt.s32.totalorder %v121_v42, 4 }
   0x6   :  { %223 = vmatpush3.msra.mxu0 %v13_v3 }
   0x7   :  { %224 = vmatprep.subr.mxu0 %v246_v0 }
   0x8   :  { %225 = vmatpush3.msra.mxu0 %v12_v4 }
   0x9   :  { %226 = vmatprep.subr.mxu0 %v246_v0 }
   0xa   :  { %227 = vmatpush3.msra.mxu0 %v11_v5 }
   0xb   :  { %229 = vmatmul.mubr.msk.f32.vlgmr.msra.gmra.mxu0 %vm17_vm2, %v16_v6 }
  0xcb   :  { %v286_v7 = vpop.f32.mrf.mxu0 }
  0xcc   :  { %104 = vrot.lane.b32.xlu0 %v286_v7, %s248_s21  ;;  %v96_v8 = vsel %vm95_vm3, %v286_v7, 0.0  ;;  %v99_v10 = vmul.f32 %v286_v7, %v286_v7 }
  0xcd   :  { %97 = vadd.xlane.f32.xlu1 %v96_v8  ;;  %v230_v9 = vpop.f32.mrf.mxu0 }
  0xce   :  { %v100_v12 = vsel %vm95_vm3, %v99_v10, 0.0 }
  0xd0   :  { %111 = vrot.lane.b32.xlu0 %v99_v10, %s248_s21 }
  0xef   :  { %101 = vadd.xlane.f32.xlu0 %v100_v12 }
 0x13e   :  { %v105_v13 = vpop.permute.xlu0 %104 }
 0x13f   :  { %v107_v14 = vsel %vm95_vm3, %v105_v13, 0.0 }
 0x140   :  { %108 = vadd.xlane.f32.xlu1 %v107_v14 }
 0x142   :  { %v112_v15 = vpop.permute.xlu0 %111 }
 0x143   :  { %v114_v16 = vsel %vm95_vm3, %v112_v15, 0.0 }
 0x144   :  { %115 = vadd.xlane.f32.xlu1 %v114_v16 }
 0x155   :  { %170 = vperm.xlu1 %238, %v16_v6  }
 0x156   :  { %v98_v19 = vpop.xlane.xlu1 %97 }
 0x159   :  { %239 = vset.pattern.permute.xlu1 %v250_v17 }
 0x15a   :  { %176 = vperm.xlu1 %239, %v16_v6   ;;  %v252_v6 = vmov 1  }
 0x15e   :  { %240 = vset.pattern.permute.xlu1 %v251_v18 }
 0x178   :  { %v102_v25 = vpop.xlane.xlu0 %101 }
 0x1c9   :  { %v109_v20 = vpop.xlane.xlu1 %108 }
 0x1ca   :  { %v118_v21 = vsel %vm117_vm4, %v98_v19, %v109_v20 }
 0x1cb   :  { %v124_v22 = vsel %vm123_vm5, %v118_v21, 0.0  ;;  %v132_v23 = vrot.slane %v118_v21, 4 }
 0x1cc   :  { %v125_v24 = vrot.slane %v124_v22, 4 }
 0x1cd   :  { %v134_v26 = vsel %vm123_vm5, %v132_v23, 0.0  ;;  %v116_v27 = vpop.xlane.xlu1 %115 }
 0x1ce   :  { %v126_v28 = vadd.f32 %v125_v24, %v124_v22  ;;  %v135_v29 = vrot.slane %v134_v26, 4  ;;  %v119_v30 = vsel %vm117_vm4, %v102_v25, %v116_v27 }
 0x1cf   :  { %v146_v32 = vsel %vm123_vm5, %v119_v30, 0.0  ;;  %v154_v33 = vrot.slane %v119_v30, 4 }
 0x1d0   :  { %v127_v34 = vrot.slane %v126_v28, 2  ;;  %v136_v35 = vadd.f32 %v135_v29, %v134_v26  ;;  %v147_v36 = vrot.slane %v146_v32, 4 }
 0x1d1   :  { %v156_v37 = vsel %vm123_vm5, %v154_v33, 0.0  ;;  %v171_v0 = vpop.permute.xlu1 %170 }
 0x1d2   :  { %v128_v38 = vadd.f32 %v127_v34, %v126_v28  ;;  %v137_v39 = vrot.slane %v136_v35, 2  ;;  %v148_v40 = vadd.f32 %v147_v36, %v146_v32  ;;  %v157_v41 = vrot.slane %v156_v37, 4 }
 0x1d4   :  { %v129_v43 = vrot.slane %v128_v38, 1  ;;  %v138_v44 = vadd.f32 %v137_v39, %v136_v35  ;;  %v149_v45 = vrot.slane %v148_v40, 2  ;;  %v158_v46 = vadd.f32 %v157_v41, %v156_v37 }
 0x1d5   :  { %v177_v3 = vpop.permute.xlu1 %176 }
 0x1d6   :  { %v139_v47 = vrot.slane %v138_v44, 1  ;;  %v150_v48 = vadd.f32 %v149_v45, %v148_v40  ;;  %v159_v49 = vrot.slane %v158_v46, 2  ;;  %v130_v50 = vadd.f32 %v129_v43, %v128_v38 }
 0x1d8   :  { %v140_v51 = vadd.f32 %v139_v47, %v138_v44  ;;  %v151_v52 = vrot.slane %v150_v48, 1  ;;  %v160_v53 = vadd.f32 %v159_v49, %v158_v46 }
 0x1da   :  { %v143_v54 = vsel %vm122_vm6, %v130_v50, %v140_v51  ;;  %v161_v55 = vrot.slane %v160_v53, 1  ;;  %v152_v57 = vadd.f32 %v151_v52, %v150_v48 }
 0x1db   :  { %v145_v56 = vmul.f32 0.00390625, %v143_v54 }
 0x1dc   :  { %v162_v58 = vadd.f32 %v161_v55, %v160_v53 }
 0x1dd   :  { %v165_v60 = vmul.f32 %v145_v56, %v145_v56 }
 0x1de   :  { %v163_v59 = vsel %vm122_vm6, %v152_v57, %v162_v58 }
 0x1df   :  { %v164_v61 = vmul.f32 0.00390625, %v163_v59 }
 0x1e1   :  { %v166_v62 = vsub.f32 %v164_v61, %v165_v60 }
 0x1e3   :  { %v167_v63 = vadd.f32 1e-05, %v166_v62 }
 0x1e5   :  { %244 = vrsqrt.f32 %v167_v63 }
 0x1f2   :  { %v245_v1 = vpop.eup %244 }
 0x1f3   :  { %v173_v2 = vmul.f32 %v245_v1, %v171_v0 }
 0x1f5   :  { %182 = vperm.xlu1 %240, %v173_v2   ;;  %v174_v4 = vmul.f32 %v173_v2, %v145_v56 }
 0x1f7   :  { %v179_v5 = vsub.f32 %v177_v3, %v174_v4 }
 0x1f9   :  { %241 = vset.pattern.permute.xlu1 %v252_v6  ;;  %192 = vperm.xlu0 %242, %v179_v5  }
 0x1fa   :  { %186 = vperm.xlu1 %241, %v173_v2  }
 0x1fd   :  { %243 = vset.pattern.permute.xlu0 %v252_v6 }
 0x1fe   :  { %196 = vperm.xlu1 %241, %v179_v5  }
 0x270   :  { %v183_v8 = vpop.permute.xlu1 %182 }
 0x274   :  { %v193_v11 = vpop.permute.xlu0 %192 }
 0x275   :  { %v187_v9 = vpop.permute.xlu1 %186 }
 0x276   :  { %v189_v10 = vsel %vm95_vm3, %v183_v8, %v187_v9 }
 0x277   :  { %v200_v12 = vmul.f32 %v189_v10, %v286_v7 }
 0x279   :  { %v197_v13 = vpop.permute.xlu1 %196 }
 0x27a   :  { %v199_v14 = vsel %vm95_vm3, %v193_v11, %v197_v13 }
 0x27b   :  { %v201_v15 = vadd.f32 %v200_v12, %v199_v14 }
 0x27d   :  { %vm202_vm7 = vcmp.gt.f32.partialorder %v201_v15, 0.0  ;;  %v203_v16 = vmul.f32 0.2, %v201_v15 }
 0x27f   :  { %v204_v17 = vsel %vm202_vm7, %v201_v15, %v203_v16 }
 0x280   :  { %205 = vst [vmem:[%s308_s2] sm:$0xff] %v204_v17 }

</bundles_post_ra>
